<compile_context>
chip_gen: v5e
topology: v5e:2x2
jax: 0.10.0
libtpu: 0.0.40
codegen_flags: <defaults>
</compile_context>

<pallas_src>
import functools

import jax
import jax.numpy as jnp
import numpy as np
from jax.experimental import pallas as pl
from jax.experimental.pallas import tpu as pltpu


def _round_up(x, m):
    return (x + m - 1) // m * m


# ----------------------------------------------------------------------------
# Pallas kernel: the whole encoder. Grid axis = layer index (sequential).
#   l == 0      : load node embeddings into the resident VMEM activation.
#   every l     : hcat = [x | A0@x | ... | A_{R-1}@x];  out = hcat @ Wfull[l] + b[l]
#                 x_next = relu(out)   (kept for the next layer)
#   l == L - 1  : write out (no ReLU after the last layer).
# ----------------------------------------------------------------------------
def rgcn_encoder_kernel(emb_ref, agg_ref, wfull_ref, bias_ref, out_ref,
                        x_ref, hcat_ref):
    l = pl.program_id(0)
    num_layers = pl.num_programs(0)
    num_rel = agg_ref.shape[0]          # static
    hp = x_ref.shape[1]                 # static (padded hidden, multiple of 128)

    @pl.when(l == 0)
    def _init():
        x_ref[...] = emb_ref[...]

    x = x_ref[...]

    # Fused LHS: [ x | A0@x | ... | A_{R-1}@x ]  -> (N, (R+1)*Hp), lane-dense.
    hcat_ref[:, 0:hp] = x
    for r in range(num_rel):            # static unroll, R is small
        hcat_ref[:, (r + 1) * hp:(r + 2) * hp] = jnp.dot(
            agg_ref[r], x, preferred_element_type=jnp.float32)

    # One MXU call per layer: root transform + all relation transforms + bias.
    out = (jnp.dot(hcat_ref[...], wfull_ref[0],
                   preferred_element_type=jnp.float32)
           + bias_ref[0])

    # ReLU only *between* layers; stash activation for the next grid step.
    x_ref[...] = jnp.maximum(out, 0.0)
    # TODO(synk): F.dropout applies only in training mode; this kernel
    # implements the inference path (training=False -> identity).

    @pl.when(l == num_layers - 1)
    def _finalize():
        out_ref[...] = out


def rgcn_encoder_pallas(emb_p, agg_p, wfull, bias_p):
    n, hp = emb_p.shape
    r = agg_p.shape[0]
    num_layers = wfull.shape[0]
    k = (r + 1) * hp
    return pl.pallas_call(
        rgcn_encoder_kernel,
        out_shape=jax.ShapeDtypeStruct((n, hp), jnp.float32),
        grid=(num_layers,),
        in_specs=[
            pl.BlockSpec((n, hp), lambda l: (0, 0)),        # node emb (grid-invariant)
            pl.BlockSpec((r, n, n), lambda l: (0, 0, 0)),   # aggregation A (invariant)
            pl.BlockSpec((1, k, hp), lambda l: (l, 0, 0)),  # packed weights of layer l
            pl.BlockSpec((1, 1, hp), lambda l: (l, 0, 0)),  # bias of layer l
        ],
        out_specs=pl.BlockSpec((n, hp), lambda l: (0, 0)),  # resident accumulator
        scratch_shapes=[
            pltpu.VMEM((n, hp), jnp.float32),               # resident activation x
            pltpu.VMEM((n, k), jnp.float32),                # fused matmul LHS
        ],
        compiler_params=pltpu.CompilerParams(
            dimension_semantics=("arbitrary",),             # layers are sequential
            vmem_limit_bytes=32 * 1024 * 1024),
    )(emb_p, agg_p, wfull, bias_p)


# ----------------------------------------------------------------------------
# Glue: parameter setup, aggregation-matrix construction, padding / packing.
# ----------------------------------------------------------------------------
def _glorot(key, shape):
    fan_in, fan_out = shape[-2], shape[-1]
    limit = float(np.sqrt(6.0 / (fan_in + fan_out)))
    return jax.random.uniform(key, shape, jnp.float32, -limit, limit)


def _block_diag(w_blocks):
    # (R, B, hb_in, hb_out) -> (R, B*hb_in, B*hb_out) block-diagonal matrices.
    r, b, hb_in, hb_out = w_blocks.shape
    w = jnp.zeros((r, b * hb_in, b * hb_out), jnp.float32)
    for i in range(b):
        w = w.at[:, i * hb_in:(i + 1) * hb_in,
                 i * hb_out:(i + 1) * hb_out].set(w_blocks[:, i])
    return w


def init_rgcn_encoder(key, num_nodes, hidden, num_relations, num_layers,
                      num_blocks=5):
    assert hidden % num_blocks == 0
    hb = hidden // num_blocks
    k_emb, *k_layers = jax.random.split(key, 1 + num_layers)
    params = {
        "node_emb": _glorot(k_emb, (num_nodes, hidden)),  # xavier_uniform_
        "layers": [],
    }
    for kl in k_layers:
        kw, kr = jax.random.split(kl)
        w_blocks = _glorot(kw, (num_relations, num_blocks, hb, hb))
        params["layers"].append({
            "w_blocks": w_blocks,
            "root": _glorot(kr, (hidden, hidden)),
            "bias": jnp.zeros((hidden,), jnp.float32),
        })
    return params


def build_agg_matrices(edge_index, edge_type, num_nodes, num_relations):
    src, dst = edge_index[0], edge_index[1]
    a = jnp.zeros((num_relations, num_nodes, num_nodes), jnp.float32)
    a = a.at[edge_type, dst, src].add(1.0)
    deg = a.sum(axis=-1, keepdims=True)          # per-relation in-degree (edges)
    return a / jnp.maximum(deg, 1.0)             # scatter_mean (0 if no edges)


def pack_layer_weights(layers, h, hp, num_relations):
    """Per layer, stack [root; W_0; ...; W_{R-1}] (zero-padded to Hp) into one
    ((R+1)*Hp, Hp) matrix so the kernel does a single fused matmul."""
    wfull, biases = [], []
    for layer in layers:
        root_p = jnp.zeros((hp, hp), jnp.float32).at[:h, :h].set(layer["root"])
        w_bd = _block_diag(layer["w_blocks"])                       # (R, h, h)
        w_p = jnp.zeros((num_relations, hp, hp), jnp.float32)
        w_p = w_p.at[:, :h, :h].set(w_bd)
        stacked = jnp.concatenate([root_p[None], w_p], axis=0)      # (R+1, hp, hp)
        wfull.append(stacked.reshape((num_relations + 1) * hp, hp))
        biases.append(jnp.zeros((1, hp), jnp.float32).at[0, :h].set(layer["bias"]))
    return jnp.stack(wfull), jnp.stack(biases)                      # (L,(R+1)hp,hp),(L,1,hp)


def rgcn_encoder_forward(params, edge_index, edge_type, num_relations):
    x = params["node_emb"]
    n, h = x.shape
    hp = _round_up(h, 128)               # lane-dense hidden
    n_p = _round_up(n, 8)                # sublane-aligned node count
    agg = build_agg_matrices(edge_index, edge_type, n, num_relations)

    # Zero padding keeps the math exact: padded lanes/rows stay identically 0.
    x_p = jnp.zeros((n_p, hp), jnp.float32).at[:n, :h].set(x)
    agg_p = jnp.zeros((num_relations, n_p, n_p), jnp.float32).at[:, :n, :n].set(agg)
    wfull, bias_p = pack_layer_weights(params["layers"], h, hp, num_relations)

    out = rgcn_encoder_pallas(x_p, agg_p, wfull, bias_p)
    return out[:n, :h]


# Pure-JAX reference reproducing the PyTorch/PyG forward semantics.
def reference_forward(params, edge_index, edge_type, num_relations):
    x = params["node_emb"]
    agg = build_agg_matrices(edge_index, edge_type, x.shape[0], num_relations)
    num_layers = len(params["layers"])
    for i, layer in enumerate(params["layers"]):
        w_blocks = layer["w_blocks"]             # (R, B, hb, hb)
        _, b, hb_in, hb_out = w_blocks.shape
        out = x @ layer["root"] + layer["bias"]
        for r in range(num_relations):
            h = agg[r] @ x                       # scatter_mean over edges of type r
            h = h.reshape(-1, b, hb_in)
            h = jnp.einsum("abc,bcd->abd", h, w_blocks[r])
            out = out + h.reshape(-1, b * hb_out)
        x = out
        if i != num_layers - 1:
            x = jnp.maximum(x, 0.0)
    return x


if __name__ == "__main__":
    num_nodes = 32
    hidden_channels = 40          # divisible by num_blocks=5
    num_relations = 3
    num_layers = 2
    num_edges = 64

    key = jax.random.PRNGKey(0)
    k_param, k_src, k_type = jax.random.split(key, 3)

    params = init_rgcn_encoder(k_param, num_nodes, hidden_channels,
                               num_relations, num_layers, num_blocks=5)
    edge_index = jax.random.randint(k_src, (2, num_edges), 0, num_nodes,
                                    dtype=jnp.int32)
    edge_type = jax.random.randint(k_type, (num_edges,), 0, num_relations,
                                   dtype=jnp.int32)

    out = rgcn_encoder_forward(params, edge_index, edge_type, num_relations)
    out = jax.block_until_ready(out)

    ref = reference_forward(params, edge_index, edge_type, num_relations)
    np.testing.assert_allclose(np.asarray(out), np.asarray(ref),
                               rtol=1e-4, atol=1e-5)
    print("KERNEL_OK")
</pallas_src>

<mosaic_0001>
module attributes {stable_mosaic.version = 11 : i64} {
  func.func @rgcn_encoder_kernel(%arg0: i32, %arg1: memref<32x128xf32, #tpu.memory_space<vmem>>, %arg2: memref<3x32x32xf32, #tpu.memory_space<vmem>>, %arg3: memref<1x512x128xf32, #tpu.memory_space<vmem>>, %arg4: memref<1x1x128xf32, #tpu.memory_space<vmem>>, %arg5: memref<32x128xf32, #tpu.memory_space<vmem>>, %arg6: memref<32x128xf32, #tpu.memory_space<vmem>>, %arg7: memref<32x512xf32, #tpu.memory_space<vmem>>) attributes {dimension_semantics = [#tpu.dimension_semantics<arbitrary>], iteration_bounds = array<i64: 2>, scalar_prefetch = 0 : i64, scratch_operands = 2 : i64, tpu.core_type = #tpu.core_type<tc>, window_params = [{pipeline_mode = #tpu.pipeline_mode<synchronous>, transform_indices = @transform_0, window_bounds = array<i64: 32, 128>}, {pipeline_mode = #tpu.pipeline_mode<synchronous>, transform_indices = @transform_1, window_bounds = array<i64: 3, 32, 32>}, {transform_indices = @transform_2, window_bounds = array<i64: 1, 512, 128>}, {transform_indices = @transform_3, window_bounds = array<i64: 1, 1, 128>}, {pipeline_mode = #tpu.pipeline_mode<synchronous>, transform_indices = @transform_4, window_bounds = array<i64: 32, 128>}]} {
    %c0_i32 = arith.constant 0 : i32
    %0 = arith.cmpi eq, %arg0, %c0_i32 : i32
    %1 = arith.extui %0 : i1 to i32
    %c0_i32_0 = arith.constant 0 : i32
    %2 = arith.cmpi ne, %1, %c0_i32_0 : i32
    scf.if %2 {
      %c0_29 = arith.constant 0 : index
      %c0_30 = arith.constant 0 : index
      %31 = vector.load %arg1[%c0_29, %c0_30] : memref<32x128xf32, #tpu.memory_space<vmem>>, vector<32x128xf32>
      %c0_31 = arith.constant 0 : index
      %c0_32 = arith.constant 0 : index
      %32 = vector.load %arg6[%c0_31, %c0_32] : memref<32x128xf32, #tpu.memory_space<vmem>>, vector<32x128xf32>
      tpu.vector_store %arg6[%c0_31, %c0_32], %31 {strides = array<i32>} : memref<32x128xf32, #tpu.memory_space<vmem>>, vector<32x128xf32>,
    } else {
    }
    %c0 = arith.constant 0 : index
    %c0_1 = arith.constant 0 : index
    %3 = vector.load %arg6[%c0, %c0_1] : memref<32x128xf32, #tpu.memory_space<vmem>>, vector<32x128xf32>
    %c0_2 = arith.constant 0 : index
    %c0_3 = arith.constant 0 : index
    %4 = vector.load %arg7[%c0_2, %c0_3] : memref<32x512xf32, #tpu.memory_space<vmem>>, vector<32x128xf32>
    tpu.vector_store %arg7[%c0_2, %c0_3], %3 {strides = array<i32>} : memref<32x512xf32, #tpu.memory_space<vmem>>, vector<32x128xf32>,
    %c0_4 = arith.constant 0 : index
    %c0_5 = arith.constant 0 : index
    %c0_6 = arith.constant 0 : index
    %5 = vector.load %arg2[%c0_4, %c0_5, %c0_6] : memref<3x32x32xf32, #tpu.memory_space<vmem>>, vector<1x32x32xf32>
    %6 = vector.shape_cast %5 : vector<1x32x32xf32> to vector<32x32xf32>
    %cst = arith.constant dense<0.000000e+00> : vector<32x128xf32>
    %7 = tpu.matmul %6, %3, %cst {dimension_numbers = #tpu.dot_dimension_numbers<[1], [0], [0], [1], [0, 0, 1, 1], [], []>} : vector<32x32xf32>, vector<32x128xf32>, vector<32x128xf32> -> vector<32x128xf32>
    %c0_7 = arith.constant 0 : index
    %c128 = arith.constant 128 : index
    %8 = vector.load %arg7[%c0_7, %c128] : memref<32x512xf32, #tpu.memory_space<vmem>>, vector<32x128xf32>
    tpu.vector_store %arg7[%c0_7, %c128], %7 {strides = array<i32>} : memref<32x512xf32, #tpu.memory_space<vmem>>, vector<32x128xf32>,
    %c1 = arith.constant 1 : index
    %c0_8 = arith.constant 0 : index
    %c0_9 = arith.constant 0 : index
    %9 = vector.load %arg2[%c1, %c0_8, %c0_9] : memref<3x32x32xf32, #tpu.memory_space<vmem>>, vector<1x32x32xf32>
    %10 = vector.shape_cast %9 : vector<1x32x32xf32> to vector<32x32xf32>
    %cst_10 = arith.constant dense<0.000000e+00> : vector<32x128xf32>
    %11 = tpu.matmul %10, %3, %cst_10 {dimension_numbers = #tpu.dot_dimension_numbers<[1], [0], [0], [1], [0, 0, 1, 1], [], []>} : vector<32x32xf32>, vector<32x128xf32>, vector<32x128xf32> -> vector<32x128xf32>
    %c0_11 = arith.constant 0 : index
    %c256 = arith.constant 256 : index
    %12 = vector.load %arg7[%c0_11, %c256] : memref<32x512xf32, #tpu.memory_space<vmem>>, vector<32x128xf32>
    tpu.vector_store %arg7[%c0_11, %c256], %11 {strides = array<i32>} : memref<32x512xf32, #tpu.memory_space<vmem>>, vector<32x128xf32>,
    %c2 = arith.constant 2 : index
    %c0_12 = arith.constant 0 : index
    %c0_13 = arith.constant 0 : index
    %13 = vector.load %arg2[%c2, %c0_12, %c0_13] : memref<3x32x32xf32, #tpu.memory_space<vmem>>, vector<1x32x32xf32>
    %14 = vector.shape_cast %13 : vector<1x32x32xf32> to vector<32x32xf32>
    %cst_14 = arith.constant dense<0.000000e+00> : vector<32x128xf32>
    %15 = tpu.matmul %14, %3, %cst_14 {dimension_numbers = #tpu.dot_dimension_numbers<[1], [0], [0], [1], [0, 0, 1, 1], [], []>} : vector<32x32xf32>, vector<32x128xf32>, vector<32x128xf32> -> vector<32x128xf32>
    %c0_15 = arith.constant 0 : index
    %c384 = arith.constant 384 : index
    %16 = vector.load %arg7[%c0_15, %c384] : memref<32x512xf32, #tpu.memory_space<vmem>>, vector<32x128xf32>
    tpu.vector_store %arg7[%c0_15, %c384], %15 {strides = array<i32>} : memref<32x512xf32, #tpu.memory_space<vmem>>, vector<32x128xf32>,
    %c0_16 = arith.constant 0 : index
    %c0_17 = arith.constant 0 : index
    %17 = vector.load %arg7[%c0_16, %c0_17] : memref<32x512xf32, #tpu.memory_space<vmem>>, vector<32x512xf32>
    %c0_18 = arith.constant 0 : index
    %c0_19 = arith.constant 0 : index
    %c0_20 = arith.constant 0 : index
    %18 = vector.load %arg3[%c0_18, %c0_19, %c0_20] : memref<1x512x128xf32, #tpu.memory_space<vmem>>, vector<1x512x128xf32>
    %19 = vector.shape_cast %18 : vector<1x512x128xf32> to vector<512x128xf32>
    %cst_21 = arith.constant dense<0.000000e+00> : vector<32x128xf32>
    %20 = tpu.matmul %17, %19, %cst_21 {dimension_numbers = #tpu.dot_dimension_numbers<[1], [0], [0], [1], [0, 0, 1, 1], [], []>} : vector<32x512xf32>, vector<512x128xf32>, vector<32x128xf32> -> vector<32x128xf32>
    %c0_22 = arith.constant 0 : index
    %c0_23 = arith.constant 0 : index
    %c0_24 = arith.constant 0 : index
    %21 = vector.load %arg4[%c0_22, %c0_23, %c0_24] : memref<1x1x128xf32, #tpu.memory_space<vmem>>, vector<1x1x128xf32>
    %22 = vector.shape_cast %21 : vector<1x1x128xf32> to vector<1x128xf32>
    %23 = vector.broadcast %22 : vector<1x128xf32> to vector<32x128xf32>
    %24 = arith.addf %20, %23 : vector<32x128xf32>
    %cst_25 = arith.constant 0.000000e+00 : f32
    %25 = vector.broadcast %cst_25 : f32 to vector<32x128xf32>
    %26 = arith.maximumf %24, %25 : vector<32x128xf32>
    %c0_26 = arith.constant 0 : index
    %c0_27 = arith.constant 0 : index
    %27 = vector.load %arg6[%c0_26, %c0_27] : memref<32x128xf32, #tpu.memory_space<vmem>>, vector<32x128xf32>
    tpu.vector_store %arg6[%c0_26, %c0_27], %26 {strides = array<i32>} : memref<32x128xf32, #tpu.memory_space<vmem>>, vector<32x128xf32>,
    %c1_i32 = arith.constant 1 : i32
    %28 = arith.cmpi eq, %arg0, %c1_i32 : i32
    %29 = arith.extui %28 : i1 to i32
    %c0_i32_28 = arith.constant 0 : i32
    %30 = arith.cmpi ne, %29, %c0_i32_28 : i32
    scf.if %30 {
      %c0_29 = arith.constant 0 : index
      %c0_30 = arith.constant 0 : index
      %31 = vector.load %arg5[%c0_29, %c0_30] : memref<32x128xf32, #tpu.memory_space<vmem>>, vector<32x128xf32>
      tpu.vector_store %arg5[%c0_29, %c0_30], %24 {strides = array<i32>} : memref<32x128xf32, #tpu.memory_space<vmem>>, vector<32x128xf32>,
    } else {
    }
    return
  }
  func.func @transform_0(%arg0: i32) -> (i32, i32) {
    %c0_i32 = arith.constant 0 : i32
    %c0_i32_0 = arith.constant 0 : i32
    %c0_i32_1 = arith.constant 0 : i32
    return %c0_i32, %c0_i32_0 : i32, i32
  }
  func.func @transform_1(%arg0: i32) -> (i32, i32, i32) {
    %c0_i32 = arith.constant 0 : i32
    %c0_i32_0 = arith.constant 0 : i32
    %c0_i32_1 = arith.constant 0 : i32
    %c0_i32_2 = arith.constant 0 : i32
    return %c0_i32, %c0_i32_0, %c0_i32_1 : i32, i32, i32
  }
  func.func @transform_2(%arg0: i32) -> (i32, i32, i32) {
    %c0_i32 = arith.constant 0 : i32
    %c0_i32_0 = arith.constant 0 : i32
    %c0_i32_1 = arith.constant 0 : i32
    return %arg0, %c0_i32, %c0_i32_0 : i32, i32, i32
  }
  func.func @transform_3(%arg0: i32) -> (i32, i32, i32) {
    %c0_i32 = arith.constant 0 : i32
    %c0_i32_0 = arith.constant 0 : i32
    %c0_i32_1 = arith.constant 0 : i32
    return %arg0, %c0_i32, %c0_i32_0 : i32, i32, i32
  }
  func.func @transform_4(%arg0: i32) -> (i32, i32) {
    %c0_i32 = arith.constant 0 : i32
    %c0_i32_0 = arith.constant 0 : i32
    %c0_i32_1 = arith.constant 0 : i32
    return %c0_i32, %c0_i32_0 : i32, i32
  }
}

</mosaic_0001>

<bundles_post_ra>
// kernel: tpu_custom_call.1
= control target key start
LH: loop header
LB: loop body
LE: loop exit
PB: predicated region body
PF: predicated region fallthrough
CT: control target
= control target key end

     0   :  { %9 = vsyncpa [#allocation5], 0  ;;  %s1268_s0 = inlined_call_operand.hbm [shape: f32[32,128], index: 0, kind: input, shape index: {}]   ;;  %s1269_s1 = inlined_call_operand.hbm [shape: f32[3,32,32], index: 1, kind: input, shape index: {}]   ;;  %s1270_s2 = inlined_call_operand.hbm [shape: f32[2,512,128], index: 2, kind: input, shape index: {}]   ;;  %s1271_s3 = inlined_call_operand.vmem [shape: f32[2,1,128], index: 3, kind: input, shape index: {}]   ;;  %s1272_s4 = inlined_call_operand.hbm [shape: f32[32,128], index: 4, kind: output, shape index: {}]  }
   0x1   :  { %10 = vsyncpa [#allocation8], 0 }
   0x2   :  { %11 = vsyncpa [#allocation6], 0  ;;  %s1027_s15 = smov 0   ;;  %s1029_s16 = smov 0  }
   0x3   :  { %s1031_s17 = smov 0   ;;  %s1033_s18 = smov 0  }
   0x4 LB: > { %s1046_s19 = sadd.s32 4294967295, %s993_s18   ;;  %p79_p0 = scmp.ne.s32.totalorder %s985_s16, %s981_s15  ;;  %s993_s18 = sphi %s1033_s18, %s1279_s18   ;;  %s989_s17 = sphi %s1031_s17, %s1278_s17   ;;  %s985_s16 = sphi %s1029_s16, %s1277_s16   ;;  %s981_s15 = sphi %s1027_s15, %s1276_s15  }
   0x5   : > { %p80_p1 = scmp.eq.s32.totalorder %s1046_s19, 0  ;;  %p727_p2 = scmp.ge.s32.totalorder %s993_s18, 1 }
   0x6   : > { %p137_p3 = scmp.lt.s32.totalorder %s993_s18, 3  ;;  %p728_p4 = scmp.ne.s32.totalorder %s1046_s19, 0 }
   0x7   : > { %p1055_p5 = por %p80_p1, %p79_p0  ;;  %s148_s23 = sshll.u32 %s1268_s0, 4  ;;  %s149_s23 = int_to_ptr.hbm [resolvable:$true] %s148_s23 }
   0x8   : > { %p1062_p6 = pnand %p727_p2, %p137_p3  ;;  %s995_s25 = smov [#allocation4]  }
   0x9   : > { %s150_s26 = sshll.u32 %s995_s25, 4  ;;  %s162_s29 = sshll.u32 %s1269_s1, 4  ;;  %s151_s26 = int_to_ptr.vmem [resolvable:$true] %s150_s26  ;;  %s163_s29 = int_to_ptr.hbm [resolvable:$true] %s162_s29 }
   0xa   : > { %p771_p7 = pneg %p1062_p6  ;;  %s996_s30 = smov 128  }
   0xb   : > { %s997_s5 = smov 8   ;;  %s998_s6 = smov [#allocation7]  }
   0xc   : > { %p772_p8 = pnand %p771_p7, %p80_p1  ;;  %s164_s7 = sshll.u32 %s998_s6, 4  ;;  %s165_s7 = int_to_ptr.vmem [resolvable:$true] %s164_s7 }
   0xd   : > { %s1080_s8 = sadd.s32 1, %s993_s18   ;;  %s66_s9 = sadd.s32 1, %s989_s17 }
   0xe   : > { %774 = dma.hbm_to_vmem [thread:$0]  (!%p772_p8), %s149_s23, 512, %s151_s26, [#allocation5], %s996_s30, %s996_s30, %s997_s5  }
   0xf   : > { %777 = dma.hbm_to_vmem [thread:$0]  (!%p772_p8), %s163_s29, 1536, %s165_s7, [#allocation8], %s996_s30, %s996_s30, %s997_s5  }
  0x10   : > { %s63_s10 = ssub.s32 %s993_s18, %s1080_s8  ;;  %p73_p9 = scmp.ne.s32.totalorder %s989_s17, %s985_s16 }
  0x11   : > { %p64_p10 = scmp.eq.s32.totalorder %s63_s10, 0  ;;  %p74_p11 = scmp.eq.s32.totalorder %s993_s18, 0 }
  0x12   : > { %p784_p12 = scmp.lt.s32.totalorder %s993_s18, 2  ;;  %s178_s11 = sand.u32 1, %s993_s18  }
  0x13   : > { %s1091_s12 = scalar_select %p64_p10, %s989_s17, %s66_s9  }
  0x14   : > { %p75_p13 = por %p74_p11, %p73_p9  ;;  %s180_s13 = sand.u32 1, %s989_s17  }
  0x15   : > { %s756_s14 = sshll.u32 %s993_s18, 9  ;;  %s731_s15 = sshll.u32 %s180_s13, 9 }
  0x16   : > { %s187_s23 = scalar_lea.hbm %s1270_s2, %s756_s14  ;;  %s182_s26 = scalar_lea.vmem [#allocation9], %s731_s15 }
  0x17   : > { %s188_s25 = sshll.u32 %s187_s23, 4  ;;  %s190_s27 = sshll.u32 %s182_s26, 4  ;;  %s189_s25 = int_to_ptr.hbm [resolvable:$true] %s188_s25  ;;  %s191_s27 = int_to_ptr.vmem [resolvable:$true] %s190_s27 }
  0x18   : > { %p1100_p0 = pnand %p784_p12, %p75_p13  ;;  %s179_s29 = scalar_lea.sflag [#allocation5], %s178_s11 }
  0x19   : > { %s889_s6 = sshra.s32 %s189_s25, 4  ;;  %s896_s13 = scalar_lea.hbm %s1270_s2, 1024  ;;  %s890_s6 = int_to_ptr.hbm [resolvable:$true] %s889_s6 }
  0x1a   : > { %s891_s7 = scalar_lea.hbm %s890_s6, 512  ;;  %p893_p3 = pneg %p1100_p0 }
  0x1b   : > { %p892_p2 = scmp.ne.s32.totalorder %s890_s6, %s891_s7  ;;  %p897_p9 = scmp.lt.s32.totalorder %s890_s6, %s1270_s2 }
  0x1c   : > { %p898_p10 = scmp.lt.s32.totalorder %s896_s13, %s891_s7 }
  0x1d   : > { %p894_p7 = pnand %p893_p3, %p892_p2 }
  0x1e   : > { %p899_p11 = por %p898_p10, %p897_p9 }
  0x1f   : > { %p895_p8 = pneg %p894_p7 }
  0x21   : > { %p900_p12 = pnand %p899_p11, %p895_p8 }
  0x23   : > { %903 = shalt.err (!%p900_p12)
}
  0x24   : > { %781 = dma.hbm_to_vmem [thread:$0]  (!%p1100_p0), %s189_s25, 8192, %s191_s27, %s179_s29, %s996_s30, %s996_s30, %s997_s5  }
  0x25   : > { %208 = sbr.rel (%p1062_p6) target bundleno = 376 (0x178), region = 36 }
  0x2a   : > { %964 = dma.done.wait (%p80_p1), [#allocation5], 512  }
  0x2b   : > { %966 = vsyncadd (%p80_p1), [#allocation5], 4294966784 }
  0x2c   : > { %968 = dma.done.wait (%p80_p1), [#allocation8], 1536  }
  0x2d   : > { %970 = vsyncadd (%p80_p1), [#allocation8], 4294965760  ;;  %s220_s11 = sand.u32 1, %s1046_s19   ;;  %s222_s30 = sand.u32 1, %s985_s16  }
  0x2e   : > { %s737_s5 = sshll.u32 %s222_s30, 9  ;;  %s221_s24 = scalar_lea.sflag [#allocation5], %s220_s11 }
  0x2f   : > { %s1129_s15 = scalar_lea.vmem [#allocation9], %s737_s5 }
  0x30   : > { %972 = dma.done.wait (%p1055_p5), %s221_s24, 8192  }
  0x31   : > { %974 = vsyncadd (%p1055_p5), %s221_s24, 4294959104  ;;  %p248_p6 = scmp.lt.s32.totalorder %s1046_s19, 1  ;;  %254 = sbr.rel (%p728_p4) target bundleno = 59 (0x3b), region = 52 }
  0x33   : > { %s1137_s21 = scalar_select %p248_p6, %s1046_s19, 1 }
  0x35   : > { %s250_s25 = scalar_lea.vmem %s1271_s3, %s1137_s21 }
  0x36   : > { %v255_v0 = vld [vmem:[#allocation4] sm:$0xff]  ;;  %v256_v1 = vld [vmem:[#allocation4 + $0x8] sm:$0xff]  ;;  %v257_v2 = vld [vmem:[#allocation4 + $0x10] sm:$0xff] }
  0x37   : > { %259 = vst [vmem:[#allocation2 + $0x10] sm:$0xff] %v255_v0  ;;  %v258_v3 = vld [vmem:[#allocation4 + $0x18] sm:$0xff] }
  0x38   : > { %260 = vst [vmem:[#allocation2] sm:$0xff] %v256_v1 }
  0x39   : > { %261 = vst [vmem:[#allocation2 + $0x18] sm:$0xff] %v257_v2 }
  0x3a   : > { %262 = vst [vmem:[#allocation2 + $0x8] sm:$0xff] %v258_v3 }
  0x3b PF: > { %vm275_vm0 = vcmask 261120   ;;  %v372_v8 = vld [vmem:[#allocation7 + $0x40] sm:$0xff]  ;;  %v452_v10 = vld [vmem:[%s1129_s15 + $0x78] sm:$0xff]  ;;  %v451_v11 = vld [vmem:[%s1129_s15 + $0x70] sm:$0xff]  ;;  %p751_p1 = scmp.ne.s32.totalorder %s1046_s19, 1 }
  0x3c   : > { %v271_v9 = vld [vmem:[#allocation7] sm:$0xff]  ;;  %505 = vmatpush.msra.mxu3 %v452_v10  ;;  %v500_v13 = vld [vmem:[%s1129_s15 + $0x1f8] sm:$0xff]  ;;  %v450_v14 = vld [vmem:[%s1129_s15 + $0x68] sm:$0xff] }
  0x3d   : > { %v322_v12 = vld [vmem:[#allocation7 + $0x20] sm:$0xff]  ;;  %v468_v15 = vld [vmem:[%s1129_s15 + $0xf8] sm:$0xff]  ;;  %v499_v16 = vld [vmem:[%s1129_s15 + $0x1f0] sm:$0xff] }
  0x3e   : > { %v1156_v7 = vld [vmem:[#allocation2 + $0x10] sm:$0xff]  ;;  %506 = vmatpush.msra.mxu3 %v451_v11  ;;  %v484_v17 = vld [vmem:[%s1129_s15 + $0x178] sm:$0xff]  ;;  %v449_v18 = vld [vmem:[%s1129_s15 + $0x60] sm:$0xff] }
  0x3f   : > { %v1151_v6 = vld [vmem:[#allocation2] sm:$0xff]  ;;  %v467_v19 = vld [vmem:[%s1129_s15 + $0xf0] sm:$0xff]  ;;  %v498_v20 = vld [vmem:[%s1129_s15 + $0x1e8] sm:$0xff] }
  0x40   : > { %v1147_v5 = vld [vmem:[#allocation2 + $0x18] sm:$0xff]  ;;  %507 = vmatpush.msra.mxu3 %v450_v14  ;;  %v483_v21 = vld [vmem:[%s1129_s15 + $0x170] sm:$0xff]  ;;  %v466_v23 = vld [vmem:[%s1129_s15 + $0xe8] sm:$0xff] }
  0x41   : > { %v1145_v4 = vld [vmem:[#allocation2 + $0x8] sm:$0xff]  ;;  %v448_v22 = vld [vmem:[%s1129_s15 + $0x58] sm:$0xff]  ;;  %v447_v26 = vld [vmem:[%s1129_s15 + $0x50] sm:$0xff] }
  0x42   : > { %400 = vmatpush.msra.mxu2 %v1145_v4  ;;  %300 = vmatpush.msra.mxu0 %v1145_v4  ;;  %v373_v24 = vld [vmem:[#allocation7 + $0x48] sm:$0xff]  ;;  %v497_v27 = vld [vmem:[%s1129_s15 + $0x1e0] sm:$0xff]  ;;  %v496_v32 = vld [vmem:[%s1129_s15 + $0x1d8] sm:$0xff] }
  0x43   : > { %350 = vmatpush.msra.mxu1 %v1145_v4  ;;  %v272_v25 = vld [vmem:[#allocation7 + $0x8] sm:$0xff]  ;;  %508 = vmatpush.msra.mxu3 %v449_v18  ;;  %v465_v29 = vld [vmem:[%s1129_s15 + $0xe0] sm:$0xff]  ;;  %v464_v33 = vld [vmem:[%s1129_s15 + $0xd8] sm:$0xff] }
  0x44   : > { %401 = vmatpush.msra.mxu2 %v1147_v5  ;;  %301 = vmatpush.msra.mxu0 %v1147_v5  ;;  %v323_v28 = vld [vmem:[#allocation7 + $0x28] sm:$0xff]  ;;  %v445_v34 = vld [vmem:[%s1129_s15 + $0x40] sm:$0xff]  ;;  %v495_v36 = vld [vmem:[%s1129_s15 + $0x1d0] sm:$0xff] }
  0x45   : > { %351 = vmatpush.msra.mxu1 %v1147_v5  ;;  %509 = vmatpush.msra.mxu3 %v448_v22  ;;  %v446_v30 = vld [vmem:[%s1129_s15 + $0x48] sm:$0xff]  ;;  %v481_v35 = vld [vmem:[%s1129_s15 + $0x160] sm:$0xff]  ;;  %v463_v37 = vld [vmem:[%s1129_s15 + $0xd0] sm:$0xff] }
  0x46   : > { %402 = vmatpush.msra.mxu2 %v1151_v6  ;;  %302 = vmatpush.msra.mxu0 %v1151_v6  ;;  %v482_v31 = vld [vmem:[%s1129_s15 + $0x168] sm:$0xff]  ;;  %v444_v38 = vld [vmem:[%s1129_s15 + $0x38] sm:$0xff]  ;;  %v374_v40 = vld [vmem:[#allocation7 + $0x50] sm:$0xff] }
  0x47   : > { %352 = vmatpush.msra.mxu1 %v1151_v6  ;;  %510 = vmatpush.msra.mxu3 %v447_v26  ;;  %v480_v39 = vld [vmem:[%s1129_s15 + $0x158] sm:$0xff]  ;;  %v273_v41 = vld [vmem:[#allocation7 + $0x10] sm:$0xff]  ;;  %v494_v42 = vld [vmem:[%s1129_s15 + $0x1c8] sm:$0xff] }
  0x48   : > { %403 = vmatpush.msra.mxu2 %v1156_v7  ;;  %303 = vmatpush.msra.mxu0 %v1156_v7  ;;  %v443_v43 = vld [vmem:[%s1129_s15 + $0x30] sm:$0xff]  ;;  %v462_v45 = vld [vmem:[%s1129_s15 + $0xc8] sm:$0xff]  ;;  %v493_v47 = vld [vmem:[%s1129_s15 + $0x1c0] sm:$0xff] }
  0x49   : > { %747 = vmatmul.msk.f32.vlgmr.msra.gmra.mxu2 %vm275_vm0, %v372_v8  ;;  %739 = vmatmul.msk.f32.vlgmr.msra.gmra.mxu0 %vm275_vm0, %v271_v9  ;;  %v324_v44 = vld [vmem:[#allocation7 + $0x30] sm:$0xff]  ;;  %v442_v48 = vld [vmem:[%s1129_s15 + $0x28] sm:$0xff]  ;;  %v461_v49 = vld [vmem:[%s1129_s15 + $0xc0] sm:$0xff] }
  0x4a   : > { %353 = vmatpush.msra.mxu1 %v1156_v7  ;;  %592 = vmatpush.msrb.mxu2 %v500_v13  ;;  %v479_v46 = vld [vmem:[%s1129_s15 + $0x150] sm:$0xff]  ;;  %v478_v50 = vld [vmem:[%s1129_s15 + $0x148] sm:$0xff]  ;;  %v492_v51 = vld [vmem:[%s1129_s15 + $0x1b8] sm:$0xff] }
  0x4b   : > { %743 = vmatmul.msk.f32.vlgmr.msra.gmra.mxu1 %vm275_vm0, %v322_v12  ;;  %534 = vmatpush.msrb.mxu0 %v468_v15  ;;  %v441_v52 = vld [vmem:[%s1129_s15 + $0x20] sm:$0xff]  ;;  %v460_v53 = vld [vmem:[%s1129_s15 + $0xb8] sm:$0xff]  ;;  %v491_v55 = vld [vmem:[%s1129_s15 + $0x1b0] sm:$0xff] }
  0x4c   : > { %593 = vmatpush.msrb.mxu2 %v499_v16  ;;  %563 = vmatpush.msrb.mxu1 %v484_v17  ;;  %v477_v54 = vld [vmem:[%s1129_s15 + $0x140] sm:$0xff]  ;;  %v375_v56 = vld [vmem:[#allocation7 + $0x58] sm:$0xff]  ;;  %v459_v59 = vld [vmem:[%s1129_s15 + $0xb0] sm:$0xff] }
  0x4d   : > { %535 = vmatpush.msrb.mxu0 %v467_v19  ;;  %511 = vmatpush.msra.mxu3 %v446_v30  ;;  %v274_v57 = vld [vmem:[#allocation7 + $0x18] sm:$0xff]  ;;  %v490_v61 = vld [vmem:[%s1129_s15 + $0x1a8] sm:$0xff]  ;;  %v439_v63 = vld [vmem:[%s1129_s15 + $0x10] sm:$0xff] }
  0x4e   : > { %594 = vmatpush.msrb.mxu2 %v498_v20  ;;  %564 = vmatpush.msrb.mxu1 %v483_v21  ;;  %v440_v58 = vld [vmem:[%s1129_s15 + $0x18] sm:$0xff]  ;;  %v458_v0 = vld [vmem:[%s1129_s15 + $0xa8] sm:$0xff]  ;;  %v489_v1 = vld [vmem:[%s1129_s15 + $0x1a0] sm:$0xff] }
  0x4f   : > { %536 = vmatpush.msrb.mxu0 %v466_v23  ;;  %512 = vmatpush.msra.mxu3 %v445_v34  ;;  %v325_v60 = vld [vmem:[#allocation7 + $0x38] sm:$0xff]  ;;  %v475_v2 = vld [vmem:[%s1129_s15 + $0x130] sm:$0xff]  ;;  %v438_v3 = vld [vmem:[%s1129_s15 + $0x8] sm:$0xff] }
  0x50   : > { %595 = vmatpush.msrb.mxu2 %v497_v27  ;;  %565 = vmatpush.msrb.mxu1 %v482_v31  ;;  %v476_v62 = vld [vmem:[%s1129_s15 + $0x138] sm:$0xff]  ;;  %v457_v8 = vld [vmem:[%s1129_s15 + $0xa0] sm:$0xff]  ;;  %v474_v10 = vld [vmem:[%s1129_s15 + $0x128] sm:$0xff] }
  0x51   : > { %748 = vmatmul.msk.f32.gmra.mxu2 %vm275_vm0, %v373_v24  ;;  %740 = vmatmul.msk.f32.gmra.mxu0 %vm275_vm0, %v272_v25  ;;  %v488_v9 = vld [vmem:[%s1129_s15 + $0x198] sm:$0xff]  ;;  %v437_v11 = vld [vmem:[%s1129_s15] sm:$0xff]  ;;  %v487_v14 = vld [vmem:[%s1129_s15 + $0x190] sm:$0xff] }
  0x52   : > { %537 = vmatpush.msrb.mxu0 %v465_v29  ;;  %596 = vmatpush.msrb.mxu2 %v496_v32  ;;  %v456_v12 = vld [vmem:[%s1129_s15 + $0x98] sm:$0xff]  ;;  %v473_v13 = vld [vmem:[%s1129_s15 + $0x120] sm:$0xff]  ;;  %v455_v15 = vld [vmem:[%s1129_s15 + $0x90] sm:$0xff] }
  0x53   : > { %744 = vmatmul.msk.f32.gmra.mxu1 %vm275_vm0, %v323_v28  ;;  %513 = vmatpush.msra.mxu3 %v444_v38  ;;  %v472_v16 = vld [vmem:[%s1129_s15 + $0x118] sm:$0xff]  ;;  %v486_v17 = vld [vmem:[%s1129_s15 + $0x188] sm:$0xff]  ;;  %v471_v19 = vld [vmem:[%s1129_s15 + $0x110] sm:$0xff] }
  0x54   : > { %538 = vmatpush.msrb.mxu0 %v464_v33  ;;  %566 = vmatpush.msrb.mxu1 %v481_v35  ;;  %v454_v18 = vld [vmem:[%s1129_s15 + $0x88] sm:$0xff]  ;;  %v485_v20 = vld [vmem:[%s1129_s15 + $0x180] sm:$0xff] }
  0x55   : > { %597 = vmatpush.msrb.mxu2 %v495_v36  ;;  %514 = vmatpush.msra.mxu3 %v443_v43  ;;  %v470_v21 = vld [vmem:[%s1129_s15 + $0x108] sm:$0xff]  ;;  %v469_v22 = vld [vmem:[%s1129_s15 + $0x100] sm:$0xff] }
  0x56   : > { %539 = vmatpush.msrb.mxu0 %v463_v37  ;;  %567 = vmatpush.msrb.mxu1 %v480_v39  ;;  %v828_v33 = vld [vmem:[%s250_s25] ss:$0 sm:$0xff] }
  0x57   : > { %598 = vmatpush.msrb.mxu2 %v494_v42  ;;  %515 = vmatpush.msra.mxu3 %v442_v48 }
  0x58   : > { %540 = vmatpush.msrb.mxu0 %v462_v45  ;;  %568 = vmatpush.msrb.mxu1 %v479_v46 }
  0x59   : > { %749 = vmatmul.msk.f32.gmra.mxu2 %vm275_vm0, %v374_v40  ;;  %741 = vmatmul.msk.f32.gmra.mxu0 %vm275_vm0, %v273_v41 }
  0x5a   : > { %599 = vmatpush.msrb.mxu2 %v493_v47  ;;  %541 = vmatpush.msrb.mxu0 %v461_v49 }
  0x5b   : > { %745 = vmatmul.msk.f32.gmra.mxu1 %vm275_vm0, %v324_v44  ;;  %516 = vmatpush.msra.mxu3 %v441_v52 }
  0x5c   : > { %569 = vmatpush.msrb.mxu1 %v478_v50  ;;  %600 = vmatpush.msrb.mxu2 %v492_v51 }
  0x5d   : > { %542 = vmatpush.msrb.mxu0 %v460_v53  ;;  %517 = vmatpush.msra.mxu3 %v440_v58 }
  0x5e   : > { %570 = vmatpush.msrb.mxu1 %v477_v54  ;;  %601 = vmatpush.msrb.mxu2 %v491_v55 }
  0x5f   : > { %543 = vmatpush.msrb.mxu0 %v459_v59  ;;  %518 = vmatpush.msra.mxu3 %v439_v63 }
  0x60   : > { %602 = vmatpush.msrb.mxu2 %v490_v61  ;;  %571 = vmatpush.msrb.mxu1 %v476_v62 }
  0x61   : > { %750 = vmatmul.msk.f32.gmra.mxu2 %vm275_vm0, %v375_v56  ;;  %742 = vmatmul.msk.f32.gmra.mxu0 %vm275_vm0, %v274_v57 }
  0x62   : > { %544 = vmatpush.msrb.mxu0 %v458_v0  ;;  %603 = vmatpush.msrb.mxu2 %v489_v1 }
  0x63   : > { %746 = vmatmul.msk.f32.gmra.mxu1 %vm275_vm0, %v325_v60  ;;  %519 = vmatpush.msra.mxu3 %v438_v3 }
  0x64   : > { %572 = vmatpush.msrb.mxu1 %v475_v2  ;;  %545 = vmatpush.msrb.mxu0 %v457_v8 }
  0x65   : > { %604 = vmatpush.msrb.mxu2 %v488_v9  ;;  %520 = vmatpush.msra.mxu3 %v437_v11 }
  0x66   : > { %573 = vmatpush.msrb.mxu1 %v474_v10  ;;  %521 = vmatmul.f32.vlgmr.msra.gmra.mxu3 %v1156_v7  ;;  %v453_v7 = vld [vmem:[%s1129_s15 + $0x80] sm:$0xff] }
  0x67   : > { %546 = vmatpush.msrb.mxu0 %v456_v12  ;;  %605 = vmatpush.msrb.mxu2 %v487_v14 }
  0x68   : > { %574 = vmatpush.msrb.mxu1 %v473_v13 }
  0x69   : > { %547 = vmatpush.msrb.mxu0 %v455_v15  ;;  %606 = vmatpush.msrb.mxu2 %v486_v17 }
  0x6a   : > { %575 = vmatpush.msrb.mxu1 %v472_v16 }
  0x6b   : > { %548 = vmatpush.msrb.mxu0 %v454_v18  ;;  %607 = vmatpush.msrb.mxu2 %v485_v20 }
  0x6c   : > { %576 = vmatpush.msrb.mxu1 %v471_v19 }
  0x6d   : > { %549 = vmatpush.msrb.mxu0 %v453_v7 }
  0x6e   : > { %524 = vmatmul.f32.gmra.mxu3 %v1151_v6  ;;  %577 = vmatpush.msrb.mxu1 %v470_v21 }
  0x70   : > { %578 = vmatpush.msrb.mxu1 %v469_v22 }
  0x76   : > { %527 = vmatmul.f32.gmra.mxu3 %v1147_v5 }
  0x7e   : > { %530 = vmatmul.f32.gmra.mxu3 %v1145_v4 }
  0xc6   : > { %v305_v23 = vpop.f32.mrf.mxu0 }
  0xc7   : > { %550 = vmatmul.f32.vlgmr.msrb.gmra.mxu0 %v305_v23 }
  0xc8   : > { %v355_v24 = vpop.f32.mrf.mxu1 }
  0xc9   : > { %579 = vmatmul.f32.vlgmr.msrb.gmra.mxu1 %v355_v24 }
  0xcc   : > { %v405_v25 = vpop.f32.mrf.mxu2 }
  0xcd   : > { %608 = vmatmul.f32.vlgmr.msrb.gmra.mxu2 %v405_v25 }
  0xce   : > { %v308_v26 = vpop.f32.mrf.mxu0 }
  0xcf   : > { %553 = vmatmul.f32.gmra.mxu0 %v308_v26 }
  0xd0   : > { %v358_v27 = vpop.f32.mrf.mxu1 }
  0xd1   : > { %582 = vmatmul.f32.gmra.mxu1 %v358_v27 }
  0xd4   : > { %v408_v5 = vpop.f32.mrf.mxu2 }
  0xd5   : > { %611 = vmatmul.f32.gmra.mxu2 %v408_v5 }
  0xd6   : > { %v311_v4 = vpop.f32.mrf.mxu0 }
  0xd7   : > { %556 = vmatmul.f32.gmra.mxu0 %v311_v4 }
  0xd8   : > { %v361_v6 = vpop.f32.mrf.mxu1 }
  0xd9   : > { %585 = vmatmul.f32.gmra.mxu1 %v361_v6 }
  0xdc   : > { %v411_v28 = vpop.f32.mrf.mxu2 }
  0xdd   : > { %614 = vmatmul.f32.gmra.mxu2 %v411_v28 }
  0xde   : > { %v314_v29 = vpop.f32.mrf.mxu0 }
  0xdf   : > { %559 = vmatmul.f32.gmra.mxu0 %v314_v29 }
  0xe0   : > { %v364_v30 = vpop.f32.mrf.mxu1 }
  0xe1   : > { %588 = vmatmul.f32.gmra.mxu1 %v364_v30 }
  0xe4   : > { %v414_v31 = vpop.f32.mrf.mxu2 }
  0xe5   : > { %617 = vmatmul.f32.gmra.mxu2 %v414_v31 }
  0xe9   : > { %v522_v32 = vpop.f32.mrf.mxu3 }
  0xea   : > { %v523_v35 = vadd.f32 %v828_v33, %v522_v32 }
  0xf1   : > { %v525_v37 = vpop.f32.mrf.mxu3 }
  0xf2   : > { %v526_v41 = vadd.f32 %v828_v33, %v525_v37 }
  0xf9   : > { %v528_v44 = vpop.f32.mrf.mxu3 }
  0xfa   : > { %v529_v50 = vadd.f32 %v828_v33, %v528_v44 }
 0x101   : > { %v531_v55 = vpop.f32.mrf.mxu3 }
 0x102   : > { %v532_v58 = vadd.f32 %v828_v33, %v531_v55 }
 0x144   : > { %v551_v34 = vpop.f32.mrf.mxu0 }
 0x145   : > { %v552_v38 = vadd.f32 %v551_v34, %v523_v35 }
 0x146   : > { %v580_v36 = vpop.f32.mrf.mxu1 }
 0x147   : > { %v581_v40 = vadd.f32 %v580_v36, %v552_v38 }
 0x14c   : > { %v554_v39 = vpop.f32.mrf.mxu0 }
 0x14d   : > { %v555_v46 = vadd.f32 %v554_v39, %v526_v41 }
 0x14e   : > { %v583_v42 = vpop.f32.mrf.mxu1 }
 0x14f   : > { %v584_v49 = vadd.f32 %v583_v42, %v555_v46 }
 0x150   : > { %v609_v43 = vpop.f32.mrf.mxu2 }
 0x151   : > { %v610_v45 = vadd.f32 %v609_v43, %v581_v40 }
 0x153   : > { %v621_v47 = vmax.f32 %v610_v45, 0.0 }
 0x154   : > { %v557_v48 = vpop.f32.mrf.mxu0 }
 0x155   : > { %625 = vst [vmem:[#allocation2 + $0x10] sm:$0xff] %v621_v47  ;;  %v558_v54 = vadd.f32 %v557_v48, %v529_v50 }
 0x156   : > { %v586_v52 = vpop.f32.mrf.mxu1 }
 0x157   : > { %v587_v57 = vadd.f32 %v586_v52, %v558_v54 }
 0x158   : > { %v612_v51 = vpop.f32.mrf.mxu2 }
 0x159   : > { %v613_v53 = vadd.f32 %v612_v51, %v584_v49 }
 0x15b   : > { %v622_v56 = vmax.f32 %v613_v53, 0.0 }
 0x15c   : > { %v560_v59 = vpop.f32.mrf.mxu0 }
 0x15d   : > { %626 = vst [vmem:[#allocation2] sm:$0xff] %v622_v56  ;;  %v561_v62 = vadd.f32 %v560_v59, %v532_v58 }
 0x15e   : > { %v589_v63 = vpop.f32.mrf.mxu1 }
 0x15f   : > { %v590_v1 = vadd.f32 %v589_v63, %v561_v62 }
 0x160   : > { %v615_v60 = vpop.f32.mrf.mxu2 }
 0x161   : > { %v616_v61 = vadd.f32 %v615_v60, %v587_v57 }
 0x163   : > { %v623_v0 = vmax.f32 %v616_v61, 0.0 }
 0x165   : > { %627 = vst [vmem:[#allocation2 + $0x18] sm:$0xff] %v623_v0 }
 0x168   : > { %v618_v2 = vpop.f32.mrf.mxu2 }
 0x169   : > { %v619_v3 = vadd.f32 %v618_v2, %v590_v1  ;;  %632 = sbr.rel (%p751_p1) target bundleno = 370 (0x172), region = 56 }
 0x16b   : > { %v624_v8 = vmax.f32 %v619_v3, 0.0 }
 0x16d   : > { %628 = vst [vmem:[#allocation2 + $0x8] sm:$0xff] %v624_v8 }
 0x16e   : > { %633 = vst [vmem:[#allocation10] sm:$0xff] %v610_v45 }
 0x16f   : > { %634 = vst [vmem:[#allocation10 + $0x8] sm:$0xff] %v613_v53 }
 0x170   : > { %635 = vst [vmem:[#allocation10 + $0x10] sm:$0xff] %v616_v61 }
 0x171   : > { %636 = vst [vmem:[#allocation10 + $0x18] sm:$0xff] %v619_v3 }
 0x172 PF: > { %p787_p4 = scmp.eq.s32.totalorder %s1046_s19, 1  ;;  %s999_s27 = smov [#allocation10]  }
 0x173   : > { %s642_s28 = sshll.u32 %s999_s27, 4  ;;  %s644_s7 = sshll.u32 %s1272_s4, 4  ;;  %s643_s28 = int_to_ptr.vmem [resolvable:$true] %s642_s28  ;;  %s645_s7 = int_to_ptr.hbm [resolvable:$true] %s644_s7 }
 0x174   : > { %s1000_s9 = smov 128   ;;  %s1001_s10 = smov 8  }
 0x175   : > { %768 = dma.vmem_to_hbm [thread:$0]  (%p787_p4), %s643_s28, 512, %s645_s7, [#allocation6], %s1000_s9, %s1000_s9, %s1001_s10  }
 0x176   : > { %976 = dma.done.wait (%p787_p4), [#allocation6], 512  }
 0x177   : > { %978 = vsyncadd (%p787_p4), [#allocation6], 4294966784 }
 0x178 PF: > { %p14_p5 = scmp.ge.s32.totalorder %s1080_s8, 4   ;;  %s1276_s15 = smov %s985_s16 }
 0x179   : > { %s1277_s16 = smov %s989_s17  ;;  %s1278_s17 = smov %s1091_s12 }
 0x17a   : > { %s1279_s18 = smov %s1080_s8  ;;  %16 = sbr.rel (!%p14_p5) target bundleno = 4 (0x4), region = 93 }
 0x17f   :  { %661 = vsyncpa [#allocation5], 1 }
 0x180   :  { %663 = vsyncpa [#allocation5 + $0x1], 1 }
 0x181   :  { %664 = vsyncpa [#allocation8], 1 }
 0x182   :  { %665 = vsyncpa [#allocation6], 1 }
 0x183   :  { %667 = vsyncpa [#allocation6 + $0x1], 1 }

</bundles_post_ra>
